<compile_context>
chip_gen: v5e
topology: v5e:2x2
jax: 0.10.0
libtpu: 0.0.40
codegen_flags: <defaults>
</compile_context>

<pallas_src>
import numpy as np
import jax
import jax.numpy as jnp
from jax import lax
from jax.experimental import pallas as pl
from jax.experimental.pallas import tpu as pltpu

WINDOW_SIZE = 11
GAUSSIAN_SIGMA = 1.5
C1 = (0.01 * 255.0) ** 2
C2 = (0.03 * 255.0) ** 2


def _round_up(x: int, m: int) -> int:
    return ((x + m - 1) // m) * m


def _gaussian_taps(size: int, sigma: float) -> np.ndarray:
    """Matches cv2.getGaussianKernel(size, sigma) (normalized 1D Gaussian)."""
    ax = np.arange(size, dtype=np.float64) - (size - 1) / 2.0
    g = np.exp(-(ax ** 2) / (2.0 * sigma ** 2))
    return g / g.sum()


def _gaussian_window(size: int, sigma: float) -> np.ndarray:
    g = _gaussian_taps(size, sigma)
    return np.outer(g, g)  # (size, size), sums to 1


def _vertical_block_matrix(Cb: int, H: int, ws: int, taps: np.ndarray) -> np.ndarray:
    """Block-diagonal banded (Cb*Ho, Cb*H) matrix so that Kv @ slab is the
    per-channel 1D valid Gaussian conv along H of a (Cb*H, W) slab."""
    Ho = H - ws + 1
    kv = np.zeros((Cb * Ho, Cb * H), np.float64)
    for c in range(Cb):
        for ho in range(Ho):
            kv[c * Ho + ho, c * H + ho:c * H + ho + ws] = taps
    return kv.astype(np.float32)


def _horizontal_band_matrix(W: int, ws: int, taps: np.ndarray, Wp: int) -> np.ndarray:
    """Banded (W, Wp) matrix (output columns zero-padded to a 128 multiple)
    so that slab @ Kw is the 1D valid Gaussian conv along W, lane-dense."""
    Wo = W - ws + 1
    kw = np.zeros((W, Wp), np.float64)
    for wo in range(Wo):
        kw[wo:wo + ws, wo] = taps
    return kw.astype(np.float32)


def _vmem_config():
    """Generation-aware (block_budget_bytes, vmem_limit_bytes, prefer_multi_step)."""
    try:
        cap = int(pltpu.get_tpu_info().vmem_capacity_bytes)
    except Exception:
        cap = None
    if cap is None:
        # Unknown chip: stay conservative, don't touch the scoped limit.
        return 12 * 2 ** 20, None, False
    if cap <= 64 * 2 ** 20:
        # v7x-class: 64 MiB VMEM, two TensorCores -> keep blocks small and
        # make sure there are >= 2 (even) grid steps to shard.
        return 16 * 2 ** 20, 32 * 2 ** 20, True
    # v5e / v6e: 128 MiB physical VMEM -> bigger blocks, fewer grid steps.
    return 32 * 2 ** 20, 64 * 2 ** 20, False


def _pick_block_channels(NC: int, H: int, W: int,
                         vmem_budget_bytes: int,
                         prefer_multi_step: bool) -> int:
    """Largest N*C divisor whose per-step working set fits the budget, subject
    to the BlockSpec sublane constraint (Cb*H % 8 == 0 unless Cb == NC)."""
    ws = WINDOW_SIZE
    Ho, Wo = H - ws + 1, W - ws + 1
    Wp = _round_up(Wo, 128)

    def vmem_estimate(cb: int) -> int:
        rin, rout = cb * H, cb * Ho
        return 4 * (
            2 * 2 * rin * W        # double-buffered raw/dst input blocks
            + 2 * rout * rin       # Kv (double-buffered)
            + 2 * W * Wp           # Kw (double-buffered)
            + 2 * 8 * Wp           # output tile (double-buffered)
            + 2 * rin * W          # product map + vertical-pass temporary
            + 7 * rout * Wp        # 5 conv outputs + SSIM temporaries
        )

    legal, fitting = [], []
    for cb in range(1, NC + 1):
        if NC % cb:
            continue
        if (cb * H) % 8 != 0 and cb != NC:   # (8,128) sublane constraint
            continue
        legal.append(cb)
        if cb * H > 4096:                    # bound block-diag matmul K dim
            continue
        if vmem_estimate(cb) <= vmem_budget_bytes:
            fitting.append(cb)
    if not fitting:
        return min(legal)                    # cb == NC is always legal
    if prefer_multi_step:
        even = [cb for cb in fitting if (NC // cb) >= 2 and (NC // cb) % 2 == 0]
        multi = [cb for cb in fitting if (NC // cb) >= 2]
        if even:
            return max(even)
        if multi:
            return max(multi)
    return max(fitting)


def _make_ssim_kernel(Cb: int, H: int, W: int, Wo: int, Wp: int):
    ws = WINDOW_SIZE
    Ho = H - ws + 1

    def kernel(raw_ref, dst_ref, kv_ref, kw_ref, out_ref):
        x = raw_ref[...]          # (Cb*H, W) f32, lane dim = W
        y = dst_ref[...]
        kv = kv_ref[...]          # (Cb*Ho, Cb*H) block-diag banded (vertical)
        kw = kw_ref[...]          # (W, Wp) banded, zero-padded cols (horizontal)

        def conv(m):
            # Separable Gaussian as two MXU matmuls; no sublane-shifted MACs.
            u = jnp.dot(kv, m, preferred_element_type=jnp.float32)   # (Cb*Ho, W)
            return jnp.dot(u, kw, preferred_element_type=jnp.float32)  # (Cb*Ho, Wp)

        # 5 maps convolved independently (no concatenated slab copy).
        mu_x = conv(x)
        mu_y = conv(y)
        s_xx = conv(x * x)
        s_yy = conv(y * y)
        s_xy = conv(x * y)

        mu_x2 = mu_x * mu_x
        mu_y2 = mu_y * mu_y
        mu_xy = mu_x * mu_y
        var_x = s_xx - mu_x2
        var_y = s_yy - mu_y2
        cov_xy = s_xy - mu_xy

        num = (2.0 * mu_xy + C1) * (2.0 * cov_xy + C2)
        den = (mu_x2 + mu_y2 + C1) * (var_x + var_y + C2)
        # approx=False kept for the 1e-4 tolerance vs the f64 reference.
        ssim_map = num * pl.reciprocal(den, approx=False)            # (Cb*Ho, Wp)

        # Zero the padded lanes (they would otherwise evaluate to SSIM == 1).
        lane = lax.broadcasted_iota(jnp.int32, (Cb * Ho, Wp), 1)
        ssim_map = jnp.where(lane < Wo, ssim_map, 0.0)

        # Sublane-only reduce -> lane-dense partial row; unmasked (8, Wp) store.
        row = jnp.sum(ssim_map, axis=0, keepdims=True)               # (1, Wp)
        out_ref[...] = jnp.broadcast_to(row, out_ref.shape)

    return kernel


def ssim_pallas(raw_images: jnp.ndarray, dst_images: jnp.ndarray,
                block_channels: int | None = None) -> jnp.ndarray:
    raw = raw_images.astype(jnp.float32)
    dst = dst_images.astype(jnp.float32)
    N, C, H, W = raw.shape
    ws = WINDOW_SIZE
    assert H >= ws and W >= ws, "image must be at least the window size"
    Ho, Wo = H - ws + 1, W - ws + 1
    Wp = _round_up(Wo, 128)
    NC = N * C

    budget, vmem_limit, prefer_multi = _vmem_config()
    if block_channels is None:
        block_channels = _pick_block_channels(NC, H, W, budget, prefer_multi)
    Cb = block_channels
    assert NC % Cb == 0, "block_channels must divide N*C"
    RB = Cb * H  # rows per grid step in the flattened (N*C*H, W) layout
    assert RB % 8 == 0 or Cb == NC, "Cb*H must be a multiple of 8 (or Cb == N*C)"
    G = NC // Cb

    taps = _gaussian_taps(ws, GAUSSIAN_SIGMA)
    kv = jnp.asarray(_vertical_block_matrix(Cb, H, ws, taps))     # (Cb*Ho, Cb*H)
    kw = jnp.asarray(_horizontal_band_matrix(W, ws, taps, Wp))    # (W, Wp)

    # Lane-dense 2D layout: rows = (n, c, h), cols = W (layout plumbing only).
    raw2d = raw.reshape(NC * H, W)
    dst2d = dst.reshape(NC * H, W)

    kernel = _make_ssim_kernel(Cb, H, W, Wo, Wp)

    cp_kwargs = dict(dimension_semantics=("parallel",))  # shard over TCs on v7x
    if vmem_limit is not None:
        cp_kwargs["vmem_limit_bytes"] = int(vmem_limit)

    partials = pl.pallas_call(
        kernel,
        out_shape=jax.ShapeDtypeStruct((G, 8, Wp), jnp.float32),
        grid=(G,),
        in_specs=[
            pl.BlockSpec((RB, W), lambda i: (i, 0)),        # raw  (N*C*H, W)
            pl.BlockSpec((RB, W), lambda i: (i, 0)),        # dst  (N*C*H, W)
            pl.BlockSpec((Cb * Ho, RB), lambda i: (0, 0)),  # Kv (vertical band)
            pl.BlockSpec((W, Wp), lambda i: (0, 0)),        # Kw (horizontal band)
        ],
        out_specs=pl.BlockSpec((1, 8, Wp), lambda i: (i, 0, 0)),
        compiler_params=pltpu.CompilerParams(**cp_kwargs),
    )(raw2d, dst2d, kv, kw)

    # mean over (C, Ho, Wo) per image then mean over batch == global mean
    # (equal element count per image); lane-partials keep that invariant.
    total = jnp.sum(partials[:, 0, :])
    return total / (NC * Ho * Wo)


def _ssim_reference_jax(raw, dst):
    """Pure-JAX reference (faithful 121-tap 2D conv, f32) for correctness."""
    raw = raw.astype(jnp.float32)
    dst = dst.astype(jnp.float32)
    N, C, H, W = raw.shape
    ws = WINDOW_SIZE
    Ho, Wo = H - ws + 1, W - ws + 1
    window = jnp.asarray(_gaussian_window(ws, GAUSSIAN_SIGMA), jnp.float32)

    def dwconv(x):
        acc = jnp.zeros((N, C, Ho, Wo), jnp.float32)
        for dy in range(ws):
            for dx in range(ws):
                acc = acc + window[dy, dx] * x[:, :, dy:dy + Ho, dx:dx + Wo]
        return acc

    mu_x, mu_y = dwconv(raw), dwconv(dst)
    mu_x2, mu_y2, mu_xy = mu_x * mu_x, mu_y * mu_y, mu_x * mu_y
    var_x = dwconv(raw * raw) - mu_x2
    var_y = dwconv(dst * dst) - mu_y2
    cov_xy = dwconv(raw * dst) - mu_xy
    num = (2.0 * mu_xy + C1) * (2.0 * cov_xy + C2)
    den = (mu_x2 + mu_y2 + C1) * (var_x + var_y + C2)
    per_image = jnp.mean(num / den, axis=(1, 2, 3))
    return jnp.mean(per_image, axis=0)


if __name__ == "__main__":
    key = jax.random.PRNGKey(0)
    k1, k2 = jax.random.split(key)
    # small shapes consistent with the module: N=2, C=4, H=W=16 (>= window 11)
    raw = jax.random.uniform(k1, (2, 4, 16, 16), jnp.float32, 0.0, 255.0)
    # dst = noisy version of raw so SSIM is nontrivial
    dst = jnp.clip(raw + 20.0 * jax.random.normal(k2, raw.shape, jnp.float32),
                   0.0, 255.0)

    # block_channels=4 -> grid of 2 channel blocks (exercises the tiled path).
    out = ssim_pallas(raw, dst, block_channels=4)
    jax.block_until_ready(out)

    ref = _ssim_reference_jax(raw, dst)
    assert jnp.allclose(out, ref, rtol=1e-4, atol=1e-4), (out, ref)

    print("KERNEL_OK")
</pallas_src>

<mosaic_0001>
module attributes {stable_mosaic.version = 11 : i64} {
  func.func @kernel(%arg0: i32, %arg1: memref<64x16xf32, #tpu.memory_space<vmem>>, %arg2: memref<64x16xf32, #tpu.memory_space<vmem>>, %arg3: memref<24x64xf32, #tpu.memory_space<vmem>>, %arg4: memref<16x128xf32, #tpu.memory_space<vmem>>, %arg5: memref<1x8x128xf32, #tpu.memory_space<vmem>>) attributes {dimension_semantics = [#tpu.dimension_semantics<parallel>], iteration_bounds = array<i64: 2>, scalar_prefetch = 0 : i64, scratch_operands = 0 : i64, tpu.core_type = #tpu.core_type<tc>, window_params = [{transform_indices = @transform_0, window_bounds = array<i64: 64, 16>}, {transform_indices = @transform_1, window_bounds = array<i64: 64, 16>}, {pipeline_mode = #tpu.pipeline_mode<synchronous>, transform_indices = @transform_2, window_bounds = array<i64: 24, 64>}, {pipeline_mode = #tpu.pipeline_mode<synchronous>, transform_indices = @transform_3, window_bounds = array<i64: 16, 128>}, {transform_indices = @transform_4, window_bounds = array<i64: 1, 8, 128>}]} {
    %c0 = arith.constant 0 : index
    %c0_0 = arith.constant 0 : index
    %0 = vector.load %arg1[%c0, %c0_0] : memref<64x16xf32, #tpu.memory_space<vmem>>, vector<64x16xf32>
    %c0_1 = arith.constant 0 : index
    %c0_2 = arith.constant 0 : index
    %1 = vector.load %arg2[%c0_1, %c0_2] : memref<64x16xf32, #tpu.memory_space<vmem>>, vector<64x16xf32>
    %c0_3 = arith.constant 0 : index
    %c0_4 = arith.constant 0 : index
    %2 = vector.load %arg3[%c0_3, %c0_4] : memref<24x64xf32, #tpu.memory_space<vmem>>, vector<24x64xf32>
    %c0_5 = arith.constant 0 : index
    %c0_6 = arith.constant 0 : index
    %3 = vector.load %arg4[%c0_5, %c0_6] : memref<16x128xf32, #tpu.memory_space<vmem>>, vector<16x128xf32>
    %cst = arith.constant dense<0.000000e+00> : vector<24x16xf32>
    %4 = tpu.matmul %2, %0, %cst {dimension_numbers = #tpu.dot_dimension_numbers<[1], [0], [0], [1], [0, 0, 1, 1], [], []>} : vector<24x64xf32>, vector<64x16xf32>, vector<24x16xf32> -> vector<24x16xf32>
    %cst_7 = arith.constant dense<0.000000e+00> : vector<24x128xf32>
    %5 = tpu.matmul %4, %3, %cst_7 {dimension_numbers = #tpu.dot_dimension_numbers<[1], [0], [0], [1], [0, 0, 1, 1], [], []>} : vector<24x16xf32>, vector<16x128xf32>, vector<24x128xf32> -> vector<24x128xf32>
    %cst_8 = arith.constant dense<0.000000e+00> : vector<24x16xf32>
    %6 = tpu.matmul %2, %1, %cst_8 {dimension_numbers = #tpu.dot_dimension_numbers<[1], [0], [0], [1], [0, 0, 1, 1], [], []>} : vector<24x64xf32>, vector<64x16xf32>, vector<24x16xf32> -> vector<24x16xf32>
    %cst_9 = arith.constant dense<0.000000e+00> : vector<24x128xf32>
    %7 = tpu.matmul %6, %3, %cst_9 {dimension_numbers = #tpu.dot_dimension_numbers<[1], [0], [0], [1], [0, 0, 1, 1], [], []>} : vector<24x16xf32>, vector<16x128xf32>, vector<24x128xf32> -> vector<24x128xf32>
    %8 = arith.mulf %0, %0 : vector<64x16xf32>
    %cst_10 = arith.constant dense<0.000000e+00> : vector<24x16xf32>
    %9 = tpu.matmul %2, %8, %cst_10 {dimension_numbers = #tpu.dot_dimension_numbers<[1], [0], [0], [1], [0, 0, 1, 1], [], []>} : vector<24x64xf32>, vector<64x16xf32>, vector<24x16xf32> -> vector<24x16xf32>
    %cst_11 = arith.constant dense<0.000000e+00> : vector<24x128xf32>
    %10 = tpu.matmul %9, %3, %cst_11 {dimension_numbers = #tpu.dot_dimension_numbers<[1], [0], [0], [1], [0, 0, 1, 1], [], []>} : vector<24x16xf32>, vector<16x128xf32>, vector<24x128xf32> -> vector<24x128xf32>
    %11 = arith.mulf %1, %1 : vector<64x16xf32>
    %cst_12 = arith.constant dense<0.000000e+00> : vector<24x16xf32>
    %12 = tpu.matmul %2, %11, %cst_12 {dimension_numbers = #tpu.dot_dimension_numbers<[1], [0], [0], [1], [0, 0, 1, 1], [], []>} : vector<24x64xf32>, vector<64x16xf32>, vector<24x16xf32> -> vector<24x16xf32>
    %cst_13 = arith.constant dense<0.000000e+00> : vector<24x128xf32>
    %13 = tpu.matmul %12, %3, %cst_13 {dimension_numbers = #tpu.dot_dimension_numbers<[1], [0], [0], [1], [0, 0, 1, 1], [], []>} : vector<24x16xf32>, vector<16x128xf32>, vector<24x128xf32> -> vector<24x128xf32>
    %14 = arith.mulf %0, %1 : vector<64x16xf32>
    %cst_14 = arith.constant dense<0.000000e+00> : vector<24x16xf32>
    %15 = tpu.matmul %2, %14, %cst_14 {dimension_numbers = #tpu.dot_dimension_numbers<[1], [0], [0], [1], [0, 0, 1, 1], [], []>} : vector<24x64xf32>, vector<64x16xf32>, vector<24x16xf32> -> vector<24x16xf32>
    %cst_15 = arith.constant dense<0.000000e+00> : vector<24x128xf32>
    %16 = tpu.matmul %15, %3, %cst_15 {dimension_numbers = #tpu.dot_dimension_numbers<[1], [0], [0], [1], [0, 0, 1, 1], [], []>} : vector<24x16xf32>, vector<16x128xf32>, vector<24x128xf32> -> vector<24x128xf32>
    %17 = arith.mulf %5, %5 : vector<24x128xf32>
    %18 = arith.mulf %7, %7 : vector<24x128xf32>
    %19 = arith.mulf %5, %7 : vector<24x128xf32>
    %20 = arith.subf %10, %17 : vector<24x128xf32>
    %21 = arith.subf %13, %18 : vector<24x128xf32>
    %22 = arith.subf %16, %19 : vector<24x128xf32>
    %cst_16 = arith.constant 2.000000e+00 : f32
    %23 = vector.broadcast %cst_16 : f32 to vector<24x128xf32>
    %24 = arith.mulf %23, %19 : vector<24x128xf32>
    %cst_17 = arith.constant 6.502500e+00 : f32
    %25 = vector.broadcast %cst_17 : f32 to vector<24x128xf32>
    %26 = arith.addf %24, %25 : vector<24x128xf32>
    %cst_18 = arith.constant 2.000000e+00 : f32
    %27 = vector.broadcast %cst_18 : f32 to vector<24x128xf32>
    %28 = arith.mulf %27, %22 : vector<24x128xf32>
    %cst_19 = arith.constant 5.852250e+01 : f32
    %29 = vector.broadcast %cst_19 : f32 to vector<24x128xf32>
    %30 = arith.addf %28, %29 : vector<24x128xf32>
    %31 = arith.mulf %26, %30 : vector<24x128xf32>
    %32 = arith.addf %17, %18 : vector<24x128xf32>
    %cst_20 = arith.constant 6.502500e+00 : f32
    %33 = vector.broadcast %cst_20 : f32 to vector<24x128xf32>
    %34 = arith.addf %32, %33 : vector<24x128xf32>
    %35 = arith.addf %20, %21 : vector<24x128xf32>
    %cst_21 = arith.constant 5.852250e+01 : f32
    %36 = vector.broadcast %cst_21 : f32 to vector<24x128xf32>
    %37 = arith.addf %35, %36 : vector<24x128xf32>
    %38 = arith.mulf %34, %37 : vector<24x128xf32>
    %39 = tpu.reciprocal %38 : vector<24x128xf32> -> vector<24x128xf32>
    %40 = arith.mulf %31, %39 : vector<24x128xf32>
    %41 = tpu.iota {dimensions = array<i32: 1>} : vector<24x128xi32>
    %c6_i32 = arith.constant 6 : i32
    %42 = vector.broadcast %c6_i32 : i32 to vector<24x128xi32>
    %43 = arith.cmpi slt, %41, %42 : vector<24x128xi32>
    %cst_22 = arith.constant 0.000000e+00 : f32
    %44 = vector.broadcast %cst_22 : f32 to vector<24x128xf32>
    %45 = arith.select %43, %40, %44 : vector<24x128xi1>, vector<24x128xf32>
    %cst_23 = arith.constant dense<0.000000e+00> : vector<128xf32>
    %46 = vector.multi_reduction <add>, %45, %cst_23 [0] : vector<24x128xf32> to vector<128xf32>
    %47 = vector.shape_cast %46 : vector<128xf32> to vector<1x128xf32>
    %48 = vector.shape_cast %47 : vector<1x128xf32> to vector<1x1x128xf32>
    %49 = vector.broadcast %48 : vector<1x1x128xf32> to vector<1x8x128xf32>
    %c0_24 = arith.constant 0 : index
    %c0_25 = arith.constant 0 : index
    %c0_26 = arith.constant 0 : index
    %50 = vector.load %arg5[%c0_24, %c0_25, %c0_26] : memref<1x8x128xf32, #tpu.memory_space<vmem>>, vector<1x8x128xf32>
    tpu.vector_store %arg5[%c0_24, %c0_25, %c0_26], %49 {strides = array<i32>} : memref<1x8x128xf32, #tpu.memory_space<vmem>>, vector<1x8x128xf32>,
    return
  }
  func.func @transform_0(%arg0: i32) -> (i32, i32) {
    %c0_i32 = arith.constant 0 : i32
    %c0_i32_0 = arith.constant 0 : i32
    return %arg0, %c0_i32 : i32, i32
  }
  func.func @transform_1(%arg0: i32) -> (i32, i32) {
    %c0_i32 = arith.constant 0 : i32
    %c0_i32_0 = arith.constant 0 : i32
    return %arg0, %c0_i32 : i32, i32
  }
  func.func @transform_2(%arg0: i32) -> (i32, i32) {
    %c0_i32 = arith.constant 0 : i32
    %c0_i32_0 = arith.constant 0 : i32
    %c0_i32_1 = arith.constant 0 : i32
    return %c0_i32, %c0_i32_0 : i32, i32
  }
  func.func @transform_3(%arg0: i32) -> (i32, i32) {
    %c0_i32 = arith.constant 0 : i32
    %c0_i32_0 = arith.constant 0 : i32
    %c0_i32_1 = arith.constant 0 : i32
    return %c0_i32, %c0_i32_0 : i32, i32
  }
  func.func @transform_4(%arg0: i32) -> (i32, i32, i32) {
    %c0_i32 = arith.constant 0 : i32
    %c0_i32_0 = arith.constant 0 : i32
    %c0_i32_1 = arith.constant 0 : i32
    return %arg0, %c0_i32, %c0_i32_0 : i32, i32, i32
  }
}

</mosaic_0001>

<bundles_post_ra>
// kernel: tpu_custom_call.1
= control target key start
LH: loop header
LB: loop body
LE: loop exit
PB: predicated region body
PF: predicated region fallthrough
CT: control target
= control target key end

     0   :  { %9 = vsyncpa [#allocation3], 0  ;;  %s1267_s0 = inlined_call_operand.vmem [shape: f32[128,16], index: 0, kind: input, shape index: {}]   ;;  %s1268_s1 = inlined_call_operand.vmem [shape: f32[128,16], index: 1, kind: input, shape index: {}]   ;;  %s1269_s2 = inlined_call_operand.vmem [shape: f32[24,64], index: 2, kind: input, shape index: {}]   ;;  %s1270_s3 = inlined_call_operand.vmem [shape: f32[16,128], index: 3, kind: input, shape index: {}]   ;;  %s1271_s4 = inlined_call_operand.hbm [shape: f32[2,8,128], index: 4, kind: output, shape index: {}]  }
   0x1   :  { %11 = vsyncpa [#allocation3 + $0x1], 0  ;;  %s953_s15 = smov 0   ;;  %s955_s16 = smov 0  }
   0x2   :  { %s957_s17 = smov 0   ;;  %s959_s18 = smov 0  }
   0x3 LB: > { %s775_s19 = sadd.s32 4294967295, %s926_s18   ;;  %s776_s20 = sadd.s32 4294967294, %s926_s18   ;;  %s926_s18 = sphi %s959_s18, %s1279_s18   ;;  %s922_s17 = sphi %s957_s17, %s1278_s17   ;;  %s918_s16 = sphi %s955_s16, %s1277_s16   ;;  %s914_s15 = sphi %s953_s15, %s1276_s15  }
   0x4   : > { %s976_s21 = sadd.s32 1, %s926_s18   ;;  %s118_s22 = sadd.s32 1, %s922_s17 }
   0x5   : > { %s115_s23 = ssub.s32 %s926_s18, %s976_s21  ;;  %p128_p0 = scmp.ne.s32.totalorder %s922_s17, %s918_s16 }
   0x6   : > { %p116_p1 = scmp.eq.s32.totalorder %s115_s23, 0  ;;  %p129_p2 = scmp.eq.s32.totalorder %s775_s19, 1 }
   0x7   : > { %p134_p3 = scmp.ne.s32.totalorder %s918_s16, %s914_s15  ;;  %p135_p4 = scmp.eq.s32.totalorder %s776_s20, 1 }
   0x8   : > { %s986_s24 = scalar_select %p116_p1, %s922_s17, %s118_s22  }
   0x9   : > { %p988_p5 = por %p129_p2, %p128_p0  ;;  %p992_p6 = por %p135_p4, %p134_p3 }
   0xa   : > { %p779_p7 = scmp.ge.s32.totalorder %s926_s18, 1  ;;  %p177_p8 = scmp.lt.s32.totalorder %s926_s18, 3 }
   0xc   : > { %p178_p9 = pnand %p779_p7, %p177_p8 }
   0xd   : > { %s998_s27 = sshll.u32 (!%p178_p9), %s775_s19, 3 }
   0xe   : > { %181 = sbr.rel (%p178_p9) target bundleno = 515 (0x203), region = 36  ;;  %p209_p10 = scmp.lt.s32.totalorder (!%p178_p9), %s998_s27, 15 }
   0xf   : > { %s700_s7 = scalar_lea.hbm (!%p178_p9), %s1271_s4, %s998_s27 }
  0x10   : > { %s704_s10 = sshll.u32 (!%p178_p9), %s700_s7, 4  ;;  %s705_s10 = int_to_ptr.hbm [resolvable:$true] %s704_s10 }
  0x11   : > { %s878_s12 = sshra.s32 (!%p178_p9), %s705_s10, 4  ;;  %s879_s12 = int_to_ptr.hbm [resolvable:$true] %s878_s12 }
  0x12   : > { %s880_s13 = scalar_lea.hbm (!%p178_p9), %s879_s12, 8  ;;  %p885_p0 = scmp.lt.s32.totalorder (!%p178_p9), %s879_s12, %s1271_s4 }
  0x13   : > { %s210_s28 = scalar_select %p209_p10, %s998_s27, 15  ;;  %v1045_v8 = vld [vmem:[%s1270_s3 + $0x8] sm:$0xff]  ;;  %v1084_v17 = vld [vmem:[%s1269_s2] sm:$0xff]  ;;  %vm241_vm0 = vcmask 523264   ;;  %v1117_v25 = vld [vmem:[%s1269_s2 + $0x10] sm:$0xff]  ;;  %vm277_vm1 = vcmask 130048  }
  0x14   : > { %301 = vmatpush.msra.mxu1 %v1045_v8  ;;  %362 = vmatpush.msra.mxu3 %v1045_v8  ;;  %v1104_v22 = vld [vmem:[%s1269_s2 + $0x8] sm:$0xff]  ;;  %v239_v27 = vld [vmem:[%s1270_s3] sm:$0xff]  ;;  %p881_p11 = scmp.ne.s32.totalorder %s879_s12, %s880_s13  ;;  %s884_s27 = scalar_lea.hbm %s1271_s4, 16 }
  0x15   : > { %s782_s29 = sshll.u32 %s210_s28, 3  ;;  %p886_p1 = scmp.lt.s32.totalorder %s884_s27, %s880_s13 }
  0x16   : > { %s1005_s6 = scalar_lea.vmem %s1267_s0, %s782_s29  ;;  %s1010_s9 = scalar_lea.vmem %s1268_s1, %s782_s29  ;;  %302 = vmatpush.msra.mxu1 %v239_v27  ;;  %363 = vmatpush.msra.mxu3 %v239_v27 }
  0x17   : > { %v1013_v0 = vld [vmem:[%s1005_s6 + $0x38] sm:$0xff]  ;;  %v1019_v2 = vld [vmem:[%s1005_s6 + $0x30] sm:$0xff]  ;;  %v1027_v4 = vld [vmem:[%s1005_s6 + $0x28] sm:$0xff]  ;;  %s205_s29 = sand.u32 1, %s918_s16   ;;  %p882_p12 = pnand %p881_p11, %p988_p5 }
  0x18   : > { %v1016_v1 = vld [vmem:[%s1010_s9 + $0x38] sm:$0xff]  ;;  %259 = vmatpush.msra.mxu0 %v1013_v0  ;;  %v1024_v3 = vld [vmem:[%s1010_s9 + $0x30] sm:$0xff]  ;;  %v1030_v5 = vld [vmem:[%s1010_s9 + $0x28] sm:$0xff]  ;;  %v381_v29 = vmul.f32 %v1013_v0, %v1013_v0  ;;  %v380_v30 = vmul.f32 %v1019_v2, %v1019_v2  ;;  %431 = vmatpush.msrb.mxu3 %v1045_v8  ;;  %v379_v31 = vmul.f32 %v1027_v4, %v1027_v4  ;;  %s780_s30 = sshll.u32 %s205_s29, 3  ;;  %s690_s11 = scalar_lea.sflag [#allocation3], %s205_s29 }
  0x19   : > { %321 = vmatpush.msra.mxu2 %v1016_v1  ;;  %v1035_v6 = vld [vmem:[%s1005_s6 + $0x20] sm:$0xff]  ;;  %v1048_v9 = vld [vmem:[%s1005_s6 + $0x18] sm:$0xff]  ;;  %v1058_v11 = vld [vmem:[%s1005_s6 + $0x10] sm:$0xff]  ;;  %v450_v18 = vmul.f32 %v1016_v1, %v1016_v1  ;;  %v449_v19 = vmul.f32 %v1024_v3, %v1024_v3  ;;  %v448_v20 = vmul.f32 %v1030_v5, %v1030_v5  ;;  %v519_v37 = vmul.f32 %v1016_v1, %v1013_v0  ;;  %s207_s8 = scalar_lea.vmem [#allocation2], %s780_s30  ;;  %p883_p13 = pneg %p882_p12 }
  0x1a   : > { %260 = vmatpush.msra.mxu0 %v1019_v2  ;;  %v1038_v7 = vld [vmem:[%s1010_s9 + $0x20] sm:$0xff]  ;;  %v1051_v10 = vld [vmem:[%s1010_s9 + $0x18] sm:$0xff]  ;;  %v1061_v12 = vld [vmem:[%s1010_s9 + $0x10] sm:$0xff]  ;;  %390 = vmatpush.msrb.mxu1 %v381_v29  ;;  %v378_v32 = vmul.f32 %v1035_v6, %v1035_v6  ;;  %v377_v33 = vmul.f32 %v1048_v9, %v1048_v9  ;;  %v376_v34 = vmul.f32 %v1058_v11, %v1058_v11  ;;  %p887_p2 = por %p886_p1, %p885_p0 }
  0x1b   : > { %322 = vmatpush.msra.mxu2 %v1024_v3  ;;  %v1066_v13 = vld [vmem:[%s1005_s6 + $0x8] sm:$0xff]  ;;  %v1074_v15 = vld [vmem:[%s1005_s6] sm:$0xff]  ;;  %v447_v21 = vmul.f32 %v1038_v7, %v1038_v7  ;;  %v446_v23 = vmul.f32 %v1051_v10, %v1051_v10  ;;  %v445_v24 = vmul.f32 %v1061_v12, %v1061_v12  ;;  %432 = vmatpush.msrb.mxu3 %v239_v27 }
  0x1c   : > { %261 = vmatpush.msra.mxu0 %v1027_v4  ;;  %v1069_v14 = vld [vmem:[%s1010_s9 + $0x8] sm:$0xff]  ;;  %v1077_v16 = vld [vmem:[%s1010_s9] sm:$0xff]  ;;  %391 = vmatpush.msrb.mxu1 %v380_v30  ;;  %v375_v35 = vmul.f32 %v1066_v13, %v1066_v13  ;;  %v374_v36 = vmul.f32 %v1074_v15, %v1074_v15  ;;  %v518_v39 = vmul.f32 %v1024_v3, %v1019_v2  ;;  %s702_s9 = sshll.u32 %s207_s8, 4  ;;  %p888_p3 = pnand %p887_p2, %p883_p13  ;;  %s703_s9 = int_to_ptr.vmem [resolvable:$true] %s702_s9 }
  0x1d   : > { %323 = vmatpush.msra.mxu2 %v1030_v5  ;;  %v444_v26 = vmul.f32 %v1069_v14, %v1069_v14  ;;  %v443_v28 = vmul.f32 %v1077_v16, %v1077_v16  ;;  %v517_v40 = vmul.f32 %v1030_v5, %v1027_v4  ;;  %v516_v41 = vmul.f32 %v1038_v7, %v1035_v6 }
  0x1e   : > { %262 = vmatpush.msra.mxu0 %v1035_v6  ;;  %392 = vmatpush.msrb.mxu1 %v379_v31  ;;  %v515_v43 = vmul.f32 %v1051_v10, %v1048_v9  ;;  %v514_v45 = vmul.f32 %v1061_v12, %v1058_v11  ;;  %v513_v46 = vmul.f32 %v1069_v14, %v1066_v13 }
  0x1f   : > { %324 = vmatpush.msra.mxu2 %v1038_v7  ;;  %v512_v47 = vmul.f32 %v1077_v16, %v1074_v15 }
  0x20   : > { %263 = vmatpush.msra.mxu0 %v1048_v9  ;;  %393 = vmatpush.msrb.mxu1 %v378_v32 }
  0x21   : > { %325 = vmatpush.msra.mxu2 %v1051_v10 }
  0x22   : > { %264 = vmatpush.msra.mxu0 %v1058_v11  ;;  %394 = vmatpush.msrb.mxu1 %v377_v33 }
  0x23   : > { %326 = vmatpush.msra.mxu2 %v1061_v12 }
  0x24   : > { %265 = vmatpush.msra.mxu0 %v1066_v13  ;;  %395 = vmatpush.msrb.mxu1 %v376_v34 }
  0x25   : > { %327 = vmatpush.msra.mxu2 %v1069_v14 }
  0x26   : > { %266 = vmatpush.msra.mxu0 %v1074_v15  ;;  %396 = vmatpush.msrb.mxu1 %v375_v35 }
  0x27   : > { %328 = vmatpush.msra.mxu2 %v1077_v16  ;;  %785 = vmatmul.msk.f32.vlgmr.msra.gmra.mxu0 %vm241_vm0, %v1084_v17 }
  0x28   : > { %791 = vmatmul.msk.f32.vlgmr.msra.gmra.mxu2 %vm241_vm0, %v1084_v17  ;;  %459 = vmatpush.msrb.mxu0 %v450_v18 }
  0x29   : > { %500 = vmatpush.msrb.mxu2 %v1045_v8  ;;  %397 = vmatpush.msrb.mxu1 %v374_v36 }
  0x2a   : > { %460 = vmatpush.msrb.mxu0 %v449_v19 }
  0x2b   : > { %501 = vmatpush.msrb.mxu2 %v239_v27 }
  0x2c   : > { %461 = vmatpush.msrb.mxu0 %v448_v20 }
  0x2e   : > { %462 = vmatpush.msrb.mxu0 %v447_v21 }
  0x2f   : > { %786 = vmatmul.msk.f32.gmra.mxu0 %vm241_vm0, %v1104_v22 }
  0x30   : > { %792 = vmatmul.msk.f32.gmra.mxu2 %vm241_vm0, %v1104_v22  ;;  %463 = vmatpush.msrb.mxu0 %v446_v23 }
  0x32   : > { %464 = vmatpush.msrb.mxu0 %v445_v24 }
  0x34   : > { %465 = vmatpush.msrb.mxu0 %v444_v26 }
  0x36   : > { %466 = vmatpush.msrb.mxu0 %v443_v28 }
  0x37   : > { %787 = vmatmul.msk.f32.gmra.mxu0 %vm241_vm0, %v1117_v25 }
  0x38   : > { %793 = vmatmul.msk.f32.gmra.mxu2 %vm241_vm0, %v1117_v25 }
  0x3f   : > { %803 = vmatmul.msk.f32.vlgmr.msrb.gmra.mxu0 %vm241_vm0, %v1084_v17 }
  0x47   : > { %804 = vmatmul.msk.f32.gmra.mxu0 %vm241_vm0, %v1104_v22 }
  0x4f   : > { %805 = vmatmul.msk.f32.gmra.mxu0 %vm241_vm0, %v1117_v25 }
  0xa4   : > { %v268_v38 = vpop.f32.mrf.mxu0 }
  0xa5   : > { %788 = vmatmul.msk.f32.vlgmr.msra.gmra.mxu1 %vm277_vm1, %v268_v38 }
  0xa6   : > { %528 = vmatpush.msra.mxu1 %v519_v37 }
  0xa8   : > { %529 = vmatpush.msra.mxu1 %v518_v39 }
  0xaa   : > { %530 = vmatpush.msra.mxu1 %v517_v40 }
  0xab   : > { %v330_v42 = vpop.f32.mrf.mxu2 }
  0xac   : > { %794 = vmatmul.msk.f32.vlgmr.msra.gmra.mxu3 %vm277_vm1, %v330_v42  ;;  %v271_v44 = vpop.f32.mrf.mxu0  ;;  %531 = vmatpush.msra.mxu1 %v516_v41 }
  0xad   : > { %569 = vmatpush.msra.mxu3 %v1045_v8  ;;  %789 = vmatmul.msk.f32.gmra.mxu1 %vm277_vm1, %v271_v44 }
  0xae   : > { %532 = vmatpush.msra.mxu1 %v515_v43 }
  0xaf   : > { %570 = vmatpush.msra.mxu3 %v239_v27 }
  0xb0   : > { %533 = vmatpush.msra.mxu1 %v514_v45 }
  0xb2   : > { %534 = vmatpush.msra.mxu1 %v513_v46 }
  0xb3   : > { %v333_v48 = vpop.f32.mrf.mxu2 }
  0xb4   : > { %795 = vmatmul.msk.f32.gmra.mxu3 %vm277_vm1, %v333_v48  ;;  %v274_v49 = vpop.f32.mrf.mxu0  ;;  %535 = vmatpush.msra.mxu1 %v512_v47 }
  0xb5   : > { %790 = vmatmul.msk.f32.gmra.mxu1 %vm277_vm1, %v274_v49 }
  0xbb   : > { %v336_v50 = vpop.f32.mrf.mxu2 }
  0xbc   : > { %796 = vmatmul.msk.f32.gmra.mxu3 %vm277_vm1, %v336_v50  ;;  %v468_v51 = vpop.f32.mrf.mxu0 }
  0xbd   : > { %797 = vmatmul.msk.f32.vlgmr.msrb.gmra.mxu1 %vm241_vm0, %v1084_v17  ;;  %806 = vmatmul.msk.f32.vlgmr.msrb.gmra.mxu2 %vm277_vm1, %v468_v51 }
  0xc4   : > { %v471_v52 = vpop.f32.mrf.mxu0 }
  0xc5   : > { %798 = vmatmul.msk.f32.gmra.mxu1 %vm241_vm0, %v1104_v22  ;;  %807 = vmatmul.msk.f32.gmra.mxu2 %vm277_vm1, %v471_v52 }
  0xcc   : > { %v474_v53 = vpop.f32.mrf.mxu0 }
  0xcd   : > { %799 = vmatmul.msk.f32.gmra.mxu1 %vm241_vm0, %v1117_v25  ;;  %808 = vmatmul.msk.f32.gmra.mxu2 %vm277_vm1, %v474_v53 }
  0xd5   : > { %809 = vmatmul.msk.f32.vlgmr.msra.gmra.mxu1 %vm241_vm0, %v1084_v17 }
  0xdd   : > { %810 = vmatmul.msk.f32.gmra.mxu1 %vm241_vm0, %v1104_v22 }
  0xe5   : > { %811 = vmatmul.msk.f32.gmra.mxu1 %vm241_vm0, %v1117_v25 }
 0x122   : > { %v304_v54 = vpop.f32.mrf.mxu1 }
 0x123   : > { %v581_v4 = vmul.f32 %v304_v54, %v304_v54 }
 0x12a   : > { %v1191_v55 = vpop.f32.mrf.mxu1 }
 0x12b   : > { %v582_v14 = vmul.f32 %v1191_v55, %v1191_v55 }
 0x12f   : > { %v365_v63 = vpop.f32.mrf.mxu3 }
 0x130   : > { %v584_v3 = vmul.f32 %v365_v63, %v365_v63  ;;  %v587_v36 = vmul.f32 %v365_v63, %v304_v54 }
 0x132   : > { %v1193_v56 = vpop.f32.mrf.mxu1  ;;  %v614_v6 = vadd.f32 %v584_v3, %v581_v4  ;;  %v599_v43 = vmul.f32 2.0, %v587_v36 }
 0x133   : > { %v583_v25 = vmul.f32 %v1193_v56, %v1193_v56 }
 0x134   : > { %v617_v11 = vadd.f32 6.5025, %v614_v6  ;;  %v602_v49 = vadd.f32 6.5025, %v599_v43 }
 0x137   : > { %v368_v0 = vpop.f32.mrf.mxu3 }
 0x138   : > { %v585_v12 = vmul.f32 %v368_v0, %v368_v0  ;;  %v588_v45 = vmul.f32 %v368_v0, %v1191_v55 }
 0x13a   : > { %v399_v57 = vpop.f32.mrf.mxu1  ;;  %v615_v17 = vadd.f32 %v585_v12, %v582_v14  ;;  %v600_v51 = vmul.f32 2.0, %v588_v45 }
 0x13b   : > { %800 = vmatmul.msk.f32.vlgmr.msrb.gmra.mxu3 %vm277_vm1, %v399_v57 }
 0x13c   : > { %v618_v21 = vadd.f32 6.5025, %v615_v17  ;;  %v603_v6 = vadd.f32 6.5025, %v600_v51 }
 0x13f   : > { %v1201_v1 = vpop.f32.mrf.mxu3 }
 0x140   : > { %v503_v2 = vpop.f32.mrf.mxu2  ;;  %v586_v22 = vmul.f32 %v1201_v1, %v1201_v1 }
 0x141   : > { %v593_v7 = vsub.f32 %v503_v2, %v584_v3 }
 0x142   : > { %v402_v58 = vpop.f32.mrf.mxu1  ;;  %v616_v29 = vadd.f32 %v586_v22, %v583_v25 }
 0x143   : > { %801 = vmatmul.msk.f32.gmra.mxu3 %vm277_vm1, %v402_v58  ;;  %v674_v58 = vlaneseq }
 0x144   : > { %v619_v34 = vadd.f32 6.5025, %v616_v29 }
 0x148   : > { %v506_v10 = vpop.f32.mrf.mxu2 }
 0x149   : > { %v594_v18 = vsub.f32 %v506_v10, %v585_v12 }
 0x14a   : > { %v405_v59 = vpop.f32.mrf.mxu1 }
 0x14b   : > { %802 = vmatmul.msk.f32.gmra.mxu3 %vm277_vm1, %v405_v59 }
 0x150   : > { %v509_v24 = vpop.f32.mrf.mxu2 }
 0x151   : > { %v595_v30 = vsub.f32 %v509_v24, %v586_v22 }
 0x152   : > { %v537_v60 = vpop.f32.mrf.mxu1 }
 0x153   : > { %812 = vmatmul.msk.f32.vlgmr.msra.gmra.mxu3 %vm277_vm1, %v537_v60 }
 0x15a   : > { %v540_v61 = vpop.f32.mrf.mxu1 }
 0x15b   : > { %813 = vmatmul.msk.f32.gmra.mxu3 %vm277_vm1, %v540_v61 }
 0x162   : > { %v543_v62 = vpop.f32.mrf.mxu1 }
 0x163   : > { %814 = vmatmul.msk.f32.gmra.mxu3 %vm277_vm1, %v543_v62 }
 0x1be   : > { %v434_v5 = vpop.f32.mrf.mxu3 }
 0x1bf   : > { %v590_v8 = vsub.f32 %v434_v5, %v581_v4 }
 0x1c1   : > { %v620_v9 = vadd.f32 %v593_v7, %v590_v8  ;;  %v589_v7 = vmul.f32 %v1201_v1, %v1193_v56 }
 0x1c3   : > { %v623_v13 = vadd.f32 58.5225, %v620_v9  ;;  %v675_v9 = vand.u32 127, %v674_v58  ;;  %v601_v17 = vmul.f32 2.0, %v589_v7 }
 0x1c5   : > { %v1205_v15 = vmul.f32 %v623_v13, %v617_v11  ;;  %vm676_vm10 = vcmp.lt.s32.totalorder %v675_v9, 6 }
 0x1c6   : > { %v437_v16 = vpop.f32.mrf.mxu3 }
 0x1c7   : > { %v591_v19 = vsub.f32 %v437_v16, %v582_v14  ;;  %858 = vrcp.f32 %v1205_v15  ;;  %vm634_vm3 = vweird.f32 %v1205_v15  ;;  %v640_v57 = vand.u32 2147483648, %v1205_v15 }
 0x1c8   : > { %v638_v60 = vand.u32 2147483647, %v1205_v15 }
 0x1c9   : > { %v621_v20 = vadd.f32 %v594_v18, %v591_v19  ;;  %v641_v8 = vor.u32 1.1754944e-38, %v640_v57 }
 0x1ca   : > { %vm639_vm8 = vcmp.eq.f32.partialorder %v638_v60, 8.507059e+37 }
 0x1cb   : > { %v624_v23 = vadd.f32 58.5225, %v621_v20 }
 0x1cd   : > { %v627_v26 = vmul.f32 %v624_v23, %v618_v21  ;;  %v859_v27 = vpop.eup %858 }
 0x1ce   : > { %v440_v28 = vpop.f32.mrf.mxu3  ;;  %v630_v32 = vmul.f32 %v859_v27, %v1205_v15  ;;  %vm635_vm2 = vweird.f32 %v859_v27 }
 0x1cf   : > { %860 = vrcp.f32 %v627_v26  ;;  %v592_v31 = vsub.f32 %v440_v28, %v583_v25  ;;  %vm1221_vm5 = vmor %vm634_vm3, %vm635_vm2  ;;  %vm648_vm6 = vweird.f32 %v627_v26  ;;  %v654_v63 = vand.u32 2147483648, %v627_v26 }
 0x1d0   : > { %v631_v39 = vsub.f32 1.0, %v630_v32  ;;  %v652_v5 = vand.u32 2147483647, %v627_v26 }
 0x1d1   : > { %v622_v33 = vadd.f32 %v595_v30, %v592_v31  ;;  %v655_v14 = vor.u32 1.1754944e-38, %v654_v63 }
 0x1d2   : > { %v632_v47 = vmul.f32 %v859_v27, %v631_v39  ;;  %vm653_vm9 = vcmp.eq.f32.partialorder %v652_v5, 8.507059e+37 }
 0x1d3   : > { %v625_v35 = vadd.f32 58.5225, %v622_v33 }
 0x1d4   : > { %v633_v53 = vadd.f32 %v859_v27, %v632_v47 }
 0x1d5   : > { %v861_v37 = vpop.eup %860  ;;  %v1213_v38 = vmul.f32 %v625_v35, %v619_v34 }
 0x1d6   : > { %v644_v40 = vmul.f32 %v861_v37, %v627_v26  ;;  %v572_v41 = vpop.f32.mrf.mxu3  ;;  %vm649_vm4 = vweird.f32 %v861_v37  ;;  %v637_v3 = vsel %vm1221_vm5, %v859_v27, %v633_v53  ;;  %v604_v27 = vadd.f32 6.5025, %v601_v17 }
 0x1d7   : > { %862 = vrcp.f32 %v1213_v38  ;;  %v596_v42 = vsub.f32 %v572_v41, %v587_v36  ;;  %vm650_vm7 = vmor %vm648_vm6, %vm649_vm4  ;;  %v642_v13 = vsel %vm639_vm8, %v641_v8, %v637_v3  ;;  %vm662_vm12 = vweird.f32 %v1213_v38 }
 0x1d8   : > { %v645_v44 = vsub.f32 1.0, %v644_v40  ;;  %v668_v56 = vand.u32 2147483648, %v1213_v38  ;;  %v666_v25 = vand.u32 2147483647, %v1213_v38 }
 0x1d9   : > { %v605_v46 = vmul.f32 2.0, %v596_v42 }
 0x1da   : > { %v646_v48 = vmul.f32 %v861_v37, %v645_v44  ;;  %v669_v30 = vor.u32 1.1754944e-38, %v668_v56  ;;  %vm667_vm14 = vcmp.eq.f32.partialorder %v666_v25, 8.507059e+37 }
 0x1db   : > { %v608_v52 = vadd.f32 58.5225, %v605_v46 }
 0x1dc   : > { %v647_v61 = vadd.f32 %v861_v37, %v646_v48 }
 0x1dd   : > { %v863_v50 = vpop.eup %862  ;;  %v611_v2 = vmul.f32 %v608_v52, %v602_v49 }
 0x1de   : > { %v658_v54 = vmul.f32 %v863_v50, %v1213_v38  ;;  %v575_v59 = vpop.f32.mrf.mxu3  ;;  %v651_v11 = vsel %vm650_vm7, %v861_v37, %v647_v61  ;;  %vm663_vm11 = vweird.f32 %v863_v50 }
 0x1df   : > { %v597_v55 = vsub.f32 %v575_v59, %v588_v45  ;;  %v671_v15 = vmul.f32 %v642_v13, %v611_v2  ;;  %v656_v18 = vsel %vm653_vm9, %v655_v14, %v651_v11  ;;  %vm664_vm13 = vmor %vm662_vm12, %vm663_vm11 }
 0x1e0   : > { %v659_v0 = vsub.f32 1.0, %v658_v54 }
 0x1e1   : > { %v606_v4 = vmul.f32 2.0, %v597_v55  ;;  %v677_v1 = vsel %vm676_vm10, %v671_v15, 0.0 }
 0x1e2   : > { %v660_v12 = vmul.f32 %v863_v50, %v659_v0 }
 0x1e3   : > { %v609_v10 = vadd.f32 58.5225, %v606_v4 }
 0x1e4   : > { %v661_v22 = vadd.f32 %v863_v50, %v660_v12 }
 0x1e5   : > { %v612_v16 = vmul.f32 %v609_v10, %v603_v6 }
 0x1e6   : > { %v578_v19 = vpop.f32.mrf.mxu3  ;;  %v665_v29 = vsel %vm664_vm13, %v863_v50, %v661_v22 }
 0x1e7   : > { %v672_v20 = vmul.f32 %v656_v18, %v612_v16  ;;  %v598_v21 = vsub.f32 %v578_v19, %v589_v7  ;;  %v670_v32 = vsel %vm667_vm14, %v669_v30, %v665_v29 }
 0x1e9   : > { %v678_v23 = vsel %vm676_vm10, %v672_v20, 0.0  ;;  %v607_v24 = vmul.f32 2.0, %v598_v21 }
 0x1ea   : > { %v680_v26 = vadd.f32 %v678_v23, %v677_v1 }
 0x1eb   : > { %v610_v28 = vadd.f32 58.5225, %v607_v24 }
 0x1ed   : > { %v613_v31 = vmul.f32 %v610_v28, %v604_v27 }
 0x1ef   : > { %v673_v33 = vmul.f32 %v670_v32, %v613_v31 }
 0x1f1   : > { %v679_v34 = vsel %vm676_vm10, %v673_v33, 0.0 }
 0x1f2   : > { %v681_v35 = vadd.f32 %v680_v26, %v679_v34 }
 0x1f4   : > { %v682_v36 = vrot.slane %v681_v35, 4 }
 0x1f6   : > { %v683_v37 = vadd.f32 %v682_v36, %v681_v35 }
 0x1f8   : > { %v684_v39 = vrot.slane %v683_v37, 2 }
 0x1fa   : > { %v685_v38 = vadd.f32 %v684_v39, %v683_v37 }
 0x1fc   : > { %v686_v40 = vrot.slane %v685_v38, 1 }
 0x1fe   : > { %v687_v41 = vadd.f32 %v686_v40, %v685_v38 }
 0x200   : > { %688 = vst [vmem:[%s207_s8] sm:$0xff] %v687_v41 }
 0x201   : > { %891 = shalt.err (!%p888_p3)
}
 0x202   : > { %819 = dma.vmem_to_hbm [thread:$0]  (%p988_p5), %s703_s9, 128, %s705_s10, %s690_s11  }
 0x203 PF: > { %p825_p4 = scmp.ge.s32.totalorder %s926_s18, 2  ;;  %s716_s23 = sand.u32 1, %s914_s15  }
 0x204   : > { %s717_s28 = scalar_lea.sflag [#allocation3], %s716_s23 }
 0x205   : > { %p822_p7 = pnand %p825_p4, %p992_p6 }
 0x207   : > { %p823_p8 = pneg %p822_p7 }
 0x209   : > { %909 = dma.done.wait (%p823_p8), %s717_s28, 128  }
 0x20a   : > { %911 = vsyncadd (%p823_p8), %s717_s28, 4294967168  ;;  %p14_p9 = scmp.ge.s32.totalorder %s976_s21, 4   ;;  %s1276_s15 = smov %s918_s16 }
 0x20b   : > { %s1277_s16 = smov %s922_s17  ;;  %s1278_s17 = smov %s986_s24 }
 0x20c   : > { %s1279_s18 = smov %s976_s21  ;;  %16 = sbr.rel (!%p14_p9) target bundleno = 3 (0x3), region = 74 }
 0x211   :  { %723 = vsyncpa [#allocation3], 1 }
 0x212   :  { %725 = vsyncpa [#allocation3 + $0x1], 1 }

</bundles_post_ra>
